<compile_context>
chip_gen: v6e
topology: v6e:2x2x1
jax: 0.10.0
libtpu: 0.0.40
codegen_flags: <defaults>
</compile_context>

<pallas_src>
import jax
import jax.numpy as jnp
from jax.experimental import pallas as pl
from jax.experimental.pallas import tpu as pltpu


def _round_up(x, m):
    return ((x + m - 1) // m) * m


def _reward_kernel(s_ref, a_ref, ns_ref, d_ref, o_ref, no_ref,
                   w1s_ref, w1a_ref, w1ns_ref, w1d_ref, w1o_ref, w1no_ref,
                   b1_ref, w2_ref, b2_ref, out_ref):
    f32 = jnp.float32

    # Layer 1 as a sum of per-input partial matmuls.  K is tiny for every
    # operand; the MXU has huge slack because this kernel is memory-bound.
    h = jnp.dot(s_ref[...], w1s_ref[...], preferred_element_type=f32)
    h = h + jnp.dot(a_ref[...], w1a_ref[...], preferred_element_type=f32)
    h = h + jnp.dot(ns_ref[...], w1ns_ref[...], preferred_element_type=f32)
    h = h + jnp.dot(o_ref[...], w1o_ref[...], preferred_element_type=f32)
    h = h + jnp.dot(no_ref[...], w1no_ref[...], preferred_element_type=f32)
    # `done` is a single column: a K=1 MXU matmul is wasteful -> VPU broadcast.
    h = h + d_ref[...] * w1d_ref[...]
    h = h + b1_ref[...]
    h = jnp.maximum(h, 0.0)                                      # ReLU

    # Layer 2 (H -> 1): VPU multiply + XLU cross-lane reduce; b2 from SMEM.
    logit = jnp.sum(h * w2_ref[...], axis=-1, keepdims=True) + b2_ref[0]

    # reward = -logsigmoid(-logit) == softplus(logit), numerically stable form.
    out_ref[...] = jnp.maximum(logit, 0.0) + jnp.log1p(jnp.exp(-jnp.abs(logit)))


def options_reward_from_logit(state, action, next_state, done, option, next_option,
                              w1, b1, w2, b2, *, tile_b=1024):
    """Flatten inputs, run the fused MLP+softplus Pallas kernel, return (B,) rewards."""
    f32 = jnp.float32
    B = state.shape[0]

    s = state.reshape(B, -1).astype(f32)
    a = action.reshape(B, -1).astype(f32)
    ns = next_state.reshape(B, -1).astype(f32)
    d = done.reshape(B, 1).astype(f32)
    o = option.reshape(B, -1).astype(f32)
    no = next_option.reshape(B, -1).astype(f32)

    d_s, d_a, d_ns = s.shape[1], a.shape[1], ns.shape[1]
    d_o, d_no = o.shape[1], no.shape[1]
    D = d_s + d_a + d_ns + 1 + d_o + d_no
    H = w1.shape[1]
    assert w1.shape[0] == D, (w1.shape, D)

    # Split W1 by input row-block once (one-time tiny slices of the weights);
    # this is what lets us skip the per-batch feature concatenate entirely.
    w1 = w1.astype(f32)
    i = 0
    w1s = w1[i:i + d_s]; i += d_s
    w1a = w1[i:i + d_a]; i += d_a
    w1ns = w1[i:i + d_ns]; i += d_ns
    w1d = w1[i:i + 1]; i += 1
    w1o = w1[i:i + d_o]; i += d_o
    w1no = w1[i:i + d_no]

    b1_row = b1.reshape(1, H).astype(f32)
    w2_row = w2.reshape(1, H).astype(f32)    # row form for VPU mul + lane reduce
    b2_s = b2.reshape(1).astype(f32)         # SMEM scalar

    # Batch tiling: TILE_B rows per grid step.  Pad only if B is misaligned.
    tb = min(tile_b, _round_up(max(B, 1), 8))
    B_pad = _round_up(B, tb)
    if B_pad != B:
        pad = ((0, B_pad - B), (0, 0))
        s, a, ns, d, o, no = (jnp.pad(x, pad) for x in (s, a, ns, d, o, no))

    grid = (B_pad // tb,)

    def row_spec(width):
        # Per-step batch tile; last dim equals the full array width (valid even
        # when width is not a multiple of 128).
        return pl.BlockSpec((tb, width), lambda i: (i, 0))

    def resident_spec(rows, cols):
        # Same block index every grid step -> stays VMEM-resident (no re-DMA).
        return pl.BlockSpec((rows, cols), lambda i: (0, 0))

    in_specs = [
        row_spec(d_s), row_spec(d_a), row_spec(d_ns), row_spec(1),
        row_spec(d_o), row_spec(d_no),
        resident_spec(d_s, H), resident_spec(d_a, H), resident_spec(d_ns, H),
        resident_spec(1, H), resident_spec(d_o, H), resident_spec(d_no, H),
        resident_spec(1, H),                                   # b1
        resident_spec(1, H),                                   # w2 (row)
        pl.BlockSpec(memory_space=pltpu.MemorySpace.SMEM),     # b2 scalar
    ]
    out_specs = pl.BlockSpec((tb, 1), lambda i: (i, 0))

    cost = pl.CostEstimate(
        flops=2 * B_pad * D * H + 4 * B_pad * H,
        transcendentals=2 * B_pad,
        bytes_accessed=4 * (B_pad * D + B_pad + (D + 2) * H + 1),
    )

    out = pl.pallas_call(
        _reward_kernel,
        grid=grid,
        in_specs=in_specs,
        out_specs=out_specs,
        out_shape=jax.ShapeDtypeStruct((B_pad, 1), f32),
        compiler_params=pltpu.CompilerParams(
            dimension_semantics=("parallel",),   # shard the batch over v7x's 2 TCs
            vmem_limit_bytes=32 * 1024 * 1024,
        ),
        cost_estimate=cost,
    )(s, a, ns, d, o, no, w1s, w1a, w1ns, w1d, w1o, w1no, b1_row, w2_row, b2_s)

    return out[:B, 0]


if __name__ == "__main__":
    # Small deterministic example shapes consistent with the module.
    B = 2          # batch
    OBS = 16       # observation_space feature dim
    ACT = 4        # action_space feature dim (e.g. one-hot discrete(4))
    OPT = 4        # option_space feature dim (one-hot)
    HID = 32       # latent_dim / hidden width of the base MLP
    D_IN = OBS + ACT + OBS + 1 + OPT + OPT   # 45

    key = jax.random.PRNGKey(0)
    ks = jax.random.split(key, 10)

    # Deterministic synthetic parameters of the base reward MLP.
    w1 = jax.random.normal(ks[0], (D_IN, HID), dtype=jnp.float32) * 0.1
    b1 = jax.random.normal(ks[1], (HID,), dtype=jnp.float32) * 0.01
    w2 = jax.random.normal(ks[2], (HID, 1), dtype=jnp.float32) * 0.1
    b2 = jax.random.normal(ks[3], (1,), dtype=jnp.float32) * 0.01

    # Deterministic synthetic transition batch.
    state = jax.random.normal(ks[4], (B, OBS), dtype=jnp.float32)
    action = jax.random.normal(ks[5], (B, ACT), dtype=jnp.float32)
    next_state = jax.random.normal(ks[6], (B, OBS), dtype=jnp.float32)
    done = (jax.random.uniform(ks[7], (B,)) > 0.5).astype(jnp.float32)
    option = jax.nn.one_hot(jax.random.randint(ks[8], (B,), 0, OPT), OPT, dtype=jnp.float32)
    next_option = jax.nn.one_hot(jax.random.randint(ks[9], (B,), 0, OPT), OPT, dtype=jnp.float32)

    rew = options_reward_from_logit(state, action, next_state, done, option, next_option,
                                    w1, b1, w2, b2)
    jax.block_until_ready(rew)

    # Cross-check against a pure-JAX reference of the same math.
    feats = jnp.concatenate(
        [state, action, next_state, done[:, None], option, next_option], axis=-1)
    logits = jnp.maximum(feats @ w1 + b1, 0.0) @ w2 + b2
    ref = jax.nn.softplus(logits).reshape(B)
    assert rew.shape == (B,)
    assert jnp.allclose(rew, ref, atol=1e-5, rtol=1e-5)

    print("KERNEL_OK")
</pallas_src>

<mosaic_0001>
module attributes {stable_mosaic.version = 11 : i64} {
  func.func @_reward_kernel(%arg0: i32, %arg1: memref<8x16xf32, #tpu.memory_space<vmem>>, %arg2: memref<8x4xf32, #tpu.memory_space<vmem>>, %arg3: memref<8x16xf32, #tpu.memory_space<vmem>>, %arg4: memref<8x1xf32, #tpu.memory_space<vmem>>, %arg5: memref<8x4xf32, #tpu.memory_space<vmem>>, %arg6: memref<8x4xf32, #tpu.memory_space<vmem>>, %arg7: memref<16x32xf32, #tpu.memory_space<vmem>>, %arg8: memref<4x32xf32, #tpu.memory_space<vmem>>, %arg9: memref<16x32xf32, #tpu.memory_space<vmem>>, %arg10: memref<1x32xf32, #tpu.memory_space<vmem>>, %arg11: memref<4x32xf32, #tpu.memory_space<vmem>>, %arg12: memref<4x32xf32, #tpu.memory_space<vmem>>, %arg13: memref<1x32xf32, #tpu.memory_space<vmem>>, %arg14: memref<1x32xf32, #tpu.memory_space<vmem>>, %arg15: memref<1xf32, #tpu.memory_space<smem>>, %arg16: memref<8x1xf32, #tpu.memory_space<vmem>>) attributes {dimension_semantics = [#tpu.dimension_semantics<parallel>], iteration_bounds = array<i64: 1>, scalar_prefetch = 0 : i64, scratch_operands = 0 : i64, tpu.core_type = #tpu.core_type<tc>, window_params = [{transform_indices = @transform_0, window_bounds = array<i64: 8, 16>}, {transform_indices = @transform_1, window_bounds = array<i64: 8, 4>}, {transform_indices = @transform_2, window_bounds = array<i64: 8, 16>}, {transform_indices = @transform_3, window_bounds = array<i64: 8, 1>}, {transform_indices = @transform_4, window_bounds = array<i64: 8, 4>}, {transform_indices = @transform_5, window_bounds = array<i64: 8, 4>}, {pipeline_mode = #tpu.pipeline_mode<synchronous>, transform_indices = @transform_6, window_bounds = array<i64: 16, 32>}, {pipeline_mode = #tpu.pipeline_mode<synchronous>, transform_indices = @transform_7, window_bounds = array<i64: 4, 32>}, {pipeline_mode = #tpu.pipeline_mode<synchronous>, transform_indices = @transform_8, window_bounds = array<i64: 16, 32>}, {pipeline_mode = #tpu.pipeline_mode<synchronous>, transform_indices = @transform_9, window_bounds = array<i64: 1, 32>}, {pipeline_mode = #tpu.pipeline_mode<synchronous>, transform_indices = @transform_10, window_bounds = array<i64: 4, 32>}, {pipeline_mode = #tpu.pipeline_mode<synchronous>, transform_indices = @transform_11, window_bounds = array<i64: 4, 32>}, {pipeline_mode = #tpu.pipeline_mode<synchronous>, transform_indices = @transform_12, window_bounds = array<i64: 1, 32>}, {pipeline_mode = #tpu.pipeline_mode<synchronous>, transform_indices = @transform_13, window_bounds = array<i64: 1, 32>}, {transform_indices = @transform_14, window_bounds = array<i64: 1>}, {transform_indices = @transform_15, window_bounds = array<i64: 8, 1>}]} {
    %c0 = arith.constant 0 : index
    %c0_0 = arith.constant 0 : index
    %0 = vector.load %arg1[%c0, %c0_0] : memref<8x16xf32, #tpu.memory_space<vmem>>, vector<8x16xf32>
    %c0_1 = arith.constant 0 : index
    %c0_2 = arith.constant 0 : index
    %1 = vector.load %arg7[%c0_1, %c0_2] : memref<16x32xf32, #tpu.memory_space<vmem>>, vector<16x32xf32>
    %cst = arith.constant dense<0.000000e+00> : vector<8x32xf32>
    %2 = tpu.matmul %0, %1, %cst {dimension_numbers = #tpu.dot_dimension_numbers<[1], [0], [0], [1], [0, 0, 1, 1], [], []>} : vector<8x16xf32>, vector<16x32xf32>, vector<8x32xf32> -> vector<8x32xf32>
    %c0_3 = arith.constant 0 : index
    %c0_4 = arith.constant 0 : index
    %3 = vector.load %arg2[%c0_3, %c0_4] : memref<8x4xf32, #tpu.memory_space<vmem>>, vector<8x4xf32>
    %c0_5 = arith.constant 0 : index
    %c0_6 = arith.constant 0 : index
    %4 = vector.load %arg8[%c0_5, %c0_6] : memref<4x32xf32, #tpu.memory_space<vmem>>, vector<4x32xf32>
    %cst_7 = arith.constant dense<0.000000e+00> : vector<8x32xf32>
    %5 = tpu.matmul %3, %4, %cst_7 {dimension_numbers = #tpu.dot_dimension_numbers<[1], [0], [0], [1], [0, 0, 1, 1], [], []>} : vector<8x4xf32>, vector<4x32xf32>, vector<8x32xf32> -> vector<8x32xf32>
    %6 = arith.addf %2, %5 : vector<8x32xf32>
    %c0_8 = arith.constant 0 : index
    %c0_9 = arith.constant 0 : index
    %7 = vector.load %arg3[%c0_8, %c0_9] : memref<8x16xf32, #tpu.memory_space<vmem>>, vector<8x16xf32>
    %c0_10 = arith.constant 0 : index
    %c0_11 = arith.constant 0 : index
    %8 = vector.load %arg9[%c0_10, %c0_11] : memref<16x32xf32, #tpu.memory_space<vmem>>, vector<16x32xf32>
    %cst_12 = arith.constant dense<0.000000e+00> : vector<8x32xf32>
    %9 = tpu.matmul %7, %8, %cst_12 {dimension_numbers = #tpu.dot_dimension_numbers<[1], [0], [0], [1], [0, 0, 1, 1], [], []>} : vector<8x16xf32>, vector<16x32xf32>, vector<8x32xf32> -> vector<8x32xf32>
    %10 = arith.addf %6, %9 : vector<8x32xf32>
    %c0_13 = arith.constant 0 : index
    %c0_14 = arith.constant 0 : index
    %11 = vector.load %arg5[%c0_13, %c0_14] : memref<8x4xf32, #tpu.memory_space<vmem>>, vector<8x4xf32>
    %c0_15 = arith.constant 0 : index
    %c0_16 = arith.constant 0 : index
    %12 = vector.load %arg11[%c0_15, %c0_16] : memref<4x32xf32, #tpu.memory_space<vmem>>, vector<4x32xf32>
    %cst_17 = arith.constant dense<0.000000e+00> : vector<8x32xf32>
    %13 = tpu.matmul %11, %12, %cst_17 {dimension_numbers = #tpu.dot_dimension_numbers<[1], [0], [0], [1], [0, 0, 1, 1], [], []>} : vector<8x4xf32>, vector<4x32xf32>, vector<8x32xf32> -> vector<8x32xf32>
    %14 = arith.addf %10, %13 : vector<8x32xf32>
    %c0_18 = arith.constant 0 : index
    %c0_19 = arith.constant 0 : index
    %15 = vector.load %arg6[%c0_18, %c0_19] : memref<8x4xf32, #tpu.memory_space<vmem>>, vector<8x4xf32>
    %c0_20 = arith.constant 0 : index
    %c0_21 = arith.constant 0 : index
    %16 = vector.load %arg12[%c0_20, %c0_21] : memref<4x32xf32, #tpu.memory_space<vmem>>, vector<4x32xf32>
    %cst_22 = arith.constant dense<0.000000e+00> : vector<8x32xf32>
    %17 = tpu.matmul %15, %16, %cst_22 {dimension_numbers = #tpu.dot_dimension_numbers<[1], [0], [0], [1], [0, 0, 1, 1], [], []>} : vector<8x4xf32>, vector<4x32xf32>, vector<8x32xf32> -> vector<8x32xf32>
    %18 = arith.addf %14, %17 : vector<8x32xf32>
    %c0_23 = arith.constant 0 : index
    %c0_24 = arith.constant 0 : index
    %19 = vector.load %arg4[%c0_23, %c0_24] : memref<8x1xf32, #tpu.memory_space<vmem>>, vector<8x1xf32>
    %c0_25 = arith.constant 0 : index
    %c0_26 = arith.constant 0 : index
    %20 = vector.load %arg10[%c0_25, %c0_26] : memref<1x32xf32, #tpu.memory_space<vmem>>, vector<1x32xf32>
    %21 = vector.broadcast %19 : vector<8x1xf32> to vector<8x32xf32>
    %22 = vector.broadcast %20 : vector<1x32xf32> to vector<8x32xf32>
    %23 = arith.mulf %21, %22 : vector<8x32xf32>
    %24 = arith.addf %18, %23 : vector<8x32xf32>
    %c0_27 = arith.constant 0 : index
    %c0_28 = arith.constant 0 : index
    %25 = vector.load %arg13[%c0_27, %c0_28] : memref<1x32xf32, #tpu.memory_space<vmem>>, vector<1x32xf32>
    %26 = vector.broadcast %25 : vector<1x32xf32> to vector<8x32xf32>
    %27 = arith.addf %24, %26 : vector<8x32xf32>
    %cst_29 = arith.constant 0.000000e+00 : f32
    %28 = vector.broadcast %cst_29 : f32 to vector<8x32xf32>
    %29 = arith.maximumf %27, %28 : vector<8x32xf32>
    %c0_30 = arith.constant 0 : index
    %c0_31 = arith.constant 0 : index
    %30 = vector.load %arg14[%c0_30, %c0_31] : memref<1x32xf32, #tpu.memory_space<vmem>>, vector<1x32xf32>
    %31 = vector.broadcast %30 : vector<1x32xf32> to vector<8x32xf32>
    %32 = arith.mulf %29, %31 : vector<8x32xf32>
    %cst_32 = arith.constant dense<0.000000e+00> : vector<8xf32>
    %33 = vector.multi_reduction <add>, %32, %cst_32 [1] : vector<8x32xf32> to vector<8xf32>
    %34 = vector.shape_cast %33 : vector<8xf32> to vector<8x1xf32>
    %c0_33 = arith.constant 0 : index
    %35 = memref.load %arg15[%c0_33] : memref<1xf32, #tpu.memory_space<smem>>
    %36 = vector.broadcast %35 : f32 to vector<8x1xf32>
    %37 = arith.addf %34, %36 : vector<8x1xf32>
    %cst_34 = arith.constant 0.000000e+00 : f32
    %38 = vector.broadcast %cst_34 : f32 to vector<8x1xf32>
    %39 = arith.maximumf %37, %38 : vector<8x1xf32>
    %40 = math.absf %37 : vector<8x1xf32>
    %cst_35 = arith.constant 0.000000e+00 : f32
    %41 = vector.broadcast %cst_35 : f32 to vector<8x1xf32>
    %42 = arith.subf %41, %40 : vector<8x1xf32>
    %43 = math.exp %42 : vector<8x1xf32>
    %44 = math.log1p %43 : vector<8x1xf32>
    %45 = arith.addf %39, %44 : vector<8x1xf32>
    %c0_36 = arith.constant 0 : index
    %c0_37 = arith.constant 0 : index
    %46 = vector.load %arg16[%c0_36, %c0_37] : memref<8x1xf32, #tpu.memory_space<vmem>>, vector<8x1xf32>
    tpu.vector_store %arg16[%c0_36, %c0_37], %45 {strides = array<i32>} : memref<8x1xf32, #tpu.memory_space<vmem>>, vector<8x1xf32>,
    return
  }
  func.func @transform_0(%arg0: i32) -> (i32, i32) {
    %c0_i32 = arith.constant 0 : i32
    %c0_i32_0 = arith.constant 0 : i32
    return %arg0, %c0_i32 : i32, i32
  }
  func.func @transform_1(%arg0: i32) -> (i32, i32) {
    %c0_i32 = arith.constant 0 : i32
    %c0_i32_0 = arith.constant 0 : i32
    return %arg0, %c0_i32 : i32, i32
  }
  func.func @transform_2(%arg0: i32) -> (i32, i32) {
    %c0_i32 = arith.constant 0 : i32
    %c0_i32_0 = arith.constant 0 : i32
    return %arg0, %c0_i32 : i32, i32
  }
  func.func @transform_3(%arg0: i32) -> (i32, i32) {
    %c0_i32 = arith.constant 0 : i32
    %c0_i32_0 = arith.constant 0 : i32
    return %arg0, %c0_i32 : i32, i32
  }
  func.func @transform_4(%arg0: i32) -> (i32, i32) {
    %c0_i32 = arith.constant 0 : i32
    %c0_i32_0 = arith.constant 0 : i32
    return %arg0, %c0_i32 : i32, i32
  }
  func.func @transform_5(%arg0: i32) -> (i32, i32) {
    %c0_i32 = arith.constant 0 : i32
    %c0_i32_0 = arith.constant 0 : i32
    return %arg0, %c0_i32 : i32, i32
  }
  func.func @transform_6(%arg0: i32) -> (i32, i32) {
    %c0_i32 = arith.constant 0 : i32
    %c0_i32_0 = arith.constant 0 : i32
    %c0_i32_1 = arith.constant 0 : i32
    return %c0_i32, %c0_i32_0 : i32, i32
  }
  func.func @transform_7(%arg0: i32) -> (i32, i32) {
    %c0_i32 = arith.constant 0 : i32
    %c0_i32_0 = arith.constant 0 : i32
    %c0_i32_1 = arith.constant 0 : i32
    return %c0_i32, %c0_i32_0 : i32, i32
  }
  func.func @transform_8(%arg0: i32) -> (i32, i32) {
    %c0_i32 = arith.constant 0 : i32
    %c0_i32_0 = arith.constant 0 : i32
    %c0_i32_1 = arith.constant 0 : i32
    return %c0_i32, %c0_i32_0 : i32, i32
  }
  func.func @transform_9(%arg0: i32) -> (i32, i32) {
    %c0_i32 = arith.constant 0 : i32
    %c0_i32_0 = arith.constant 0 : i32
    %c0_i32_1 = arith.constant 0 : i32
    return %c0_i32, %c0_i32_0 : i32, i32
  }
  func.func @transform_10(%arg0: i32) -> (i32, i32) {
    %c0_i32 = arith.constant 0 : i32
    %c0_i32_0 = arith.constant 0 : i32
    %c0_i32_1 = arith.constant 0 : i32
    return %c0_i32, %c0_i32_0 : i32, i32
  }
  func.func @transform_11(%arg0: i32) -> (i32, i32) {
    %c0_i32 = arith.constant 0 : i32
    %c0_i32_0 = arith.constant 0 : i32
    %c0_i32_1 = arith.constant 0 : i32
    return %c0_i32, %c0_i32_0 : i32, i32
  }
  func.func @transform_12(%arg0: i32) -> (i32, i32) {
    %c0_i32 = arith.constant 0 : i32
    %c0_i32_0 = arith.constant 0 : i32
    %c0_i32_1 = arith.constant 0 : i32
    return %c0_i32, %c0_i32_0 : i32, i32
  }
  func.func @transform_13(%arg0: i32) -> (i32, i32) {
    %c0_i32 = arith.constant 0 : i32
    %c0_i32_0 = arith.constant 0 : i32
    %c0_i32_1 = arith.constant 0 : i32
    return %c0_i32, %c0_i32_0 : i32, i32
  }
  func.func @transform_14(%arg0: i32) -> i32 {
    %c0_i32 = arith.constant 0 : i32
    %c0_i32_0 = arith.constant 0 : i32
    return %c0_i32 : i32
  }
  func.func @transform_15(%arg0: i32) -> (i32, i32) {
    %c0_i32 = arith.constant 0 : i32
    %c0_i32_0 = arith.constant 0 : i32
    return %arg0, %c0_i32 : i32, i32
  }
}

</mosaic_0001>

<bundles_post_ra>
// kernel: tpu_custom_call.1
= control target key start
LH: loop header
LB: loop body
LE: loop exit
PB: predicated region body
PF: predicated region fallthrough
CT: control target
= control target key end

     0   :  { %21 = vsyncpa [#allocation4], 0  ;;  %s599_s18 = smov [#allocation3]   ;;  %s750_s0 = inlined_call_operand.vmem [shape: f32[8,16], index: 0, kind: input, shape index: {}]   ;;  %s751_s1 = inlined_call_operand.vmem [shape: f32[8,4], index: 1, kind: input, shape index: {}]   ;;  %s752_s2 = inlined_call_operand.vmem [shape: f32[8,16], index: 2, kind: input, shape index: {}]   ;;  %s753_s3 = inlined_call_operand.vmem [shape: f32[8,1], index: 3, kind: input, shape index: {}]   ;;  %s754_s4 = inlined_call_operand.vmem [shape: f32[8,4], index: 4, kind: input, shape index: {}]   ;;  %s755_s5 = inlined_call_operand.vmem [shape: f32[8,4], index: 5, kind: input, shape index: {}]   ;;  %s756_s6 = inlined_call_operand.vmem [shape: f32[16,32], index: 6, kind: input, shape index: {}]   ;;  %s757_s7 = inlined_call_operand.hbm [shape: f32[4,32], index: 7, kind: input, shape index: {}]   ;;  %s758_s8 = inlined_call_operand.vmem [shape: f32[16,32], index: 8, kind: input, shape index: {}]   ;;  %s759_s9 = inlined_call_operand.vmem [shape: f32[1,32], index: 9, kind: input, shape index: {}]   ;;  %s760_s10 = inlined_call_operand.vmem [shape: f32[4,32], index: 10, kind: input, shape index: {}]   ;;  %s761_s11 = inlined_call_operand.vmem [shape: f32[4,32], index: 11, kind: input, shape index: {}]   ;;  %s762_s12 = inlined_call_operand.vmem [shape: f32[1,32], index: 12, kind: input, shape index: {}]   ;;  %s763_s13 = inlined_call_operand.vmem [shape: f32[1,32], index: 13, kind: input, shape index: {}]   ;;  %s764_s14 = inlined_call_operand.<no memory space> [shape: f32[1], index: 14, kind: input, shape index: {}]   ;;  %s765_s15 = inlined_call_operand.vmem [shape: f32[8,1], index: 15, kind: output, shape index: {}]  }
   0x1   :  { %s42_s19 = sshll.u32 %s599_s18, 4  ;;  %s43_s19 = int_to_ptr.vmem [resolvable:$true] %s42_s19 }
   0x2   :  { %s585_s20 = scalar_lea.vmem %s43_s19, 64  ;;  %p590_p1 = scmp.lt.s32.totalorder %s43_s19, %s43_s19 }
   0x3   :  { %p586_p0 = scmp.ne.s32.totalorder %s43_s19, %s585_s20  ;;  %p591_p2 = scmp.lt.s32.totalorder %s585_s20, %s585_s20 }
   0x5   :  { %p592_p3 = por %p591_p2, %p590_p1 }
   0x7   :  { %p593_p4 = pnand %p592_p3, %p586_p0 }
   0x9   :  { %596 = shalt.err (!%p593_p4)
}
   0xa   :  { %45 = dma.hbm_to_vmem [thread:$0]  %s757_s7, 64, %s43_s19, [#allocation4]  }
   0xb   :  { %597 = dma.done.wait [#allocation4], 64  }
   0xc   :  { %598 = vsyncadd [#allocation4], 4294967232  ;;  %v600_v0 = vmov 0.0   ;;  %vm601_vm0 = vmmov 0   ;;  %v602_v1 = vmov 0   ;;  %vm72_vm1 = vcmask 1043456  }
   0xd   :  { %539 = vmatprep.subr.mxu0 %v600_v0  ;;  %544 = vmatprep.subr.mxu1 %v600_v0  ;;  %vm68_vm2 = vcmask 31744   ;;  %v67_v2 = vld [vmem:[#allocation3] sm:$0xf]  ;;  %v65_v3 = vld [vmem:[%s756_s6 + $0x8] sm:$0xff]  ;;  %vm146_vm3 = vcmask 130048   ;;  %vm487_vm4 = vcmask 261120   ;;  %v492_v39 = vstv %s764_s14 }
   0xe   :  { %541 = vmatprep.mubr.msk.f32.mxu0 %vm601_vm0, %v600_v0  ;;  %548 = vmatprep.mubr.msk.f32.mxu1 %vm601_vm0, %v600_v0  ;;  %v66_v4 = vld [vmem:[%s751_s1] sm:$0xff]  ;;  %v222_v6 = vld [vmem:[%s758_s8 + $0x8] sm:$0xff]  ;;  %vm509_vm6 = vcmask 7168  }
   0xf   :  { %572 = vset.pattern.permute.xlu0 %v602_v1  ;;  %540 = vmatpush3.msk.msra.mxu0 %vm72_vm1, %v67_v2  ;;  %v64_v5 = vld [vmem:[%s756_s6] sm:$0xff] }
  0x10   :  { %545 = vmatpush3.msra.mxu1 %v65_v3  ;;  %v63_v7 = vld [vmem:[%s750_s0] sm:$0xff]  ;;  %542 = vmatmul.mubr.msk.f32.vlgmr.msra.gmra.mxu0 %vm68_vm2, %v66_v4 }
  0x11   :  { %546 = vmatprep.subr.mxu1 %v600_v0  ;;  %551 = vmatprep.subr.mxu0 %v600_v0  ;;  %v221_v8 = vld [vmem:[%s758_s8] sm:$0xff] }
  0x12   :  { %547 = vmatpush3.msra.mxu1 %v64_v5  ;;  %552 = vmatpush3.msra.mxu0 %v222_v6  ;;  %v298_v9 = vld [vmem:[%s760_s10] sm:$0xf] }
  0x13   :  { %549 = vmatmul.mubr.msk.f32.vlgmr.msra.gmra.mxu1 %vm146_vm3, %v63_v7  ;;  %v220_v10 = vld [vmem:[%s752_s2] sm:$0xff]  ;;  %553 = vmatprep.subr.mxu0 %v600_v0 }
  0x14   :  { %558 = vmatprep.subr.mxu1 %v600_v0  ;;  %554 = vmatpush3.msra.mxu0 %v221_v8  ;;  %v377_v11 = vld [vmem:[%s761_s11] sm:$0xf] }
  0x15   :  { %555 = vmatprep.mubr.msk.f32.mxu0 %vm601_vm0, %v600_v0  ;;  %v297_v12 = vld [vmem:[%s754_s4] sm:$0xff]  ;;  %559 = vmatpush3.msk.msra.mxu1 %vm72_vm1, %v298_v9 }
  0x16   :  { %556 = vmatmul.mubr.msk.f32.vlgmr.msra.gmra.mxu0 %vm146_vm3, %v220_v10  ;;  %v455_v13 = vld [vmem:[%s753_s3] sm:$0xff]  ;;  %563 = vmatprep.subr.mxu0 %v600_v0 }
  0x17   :  { %560 = vmatprep.mubr.msk.f32.mxu1 %vm601_vm0, %v600_v0  ;;  %v376_v14 = vld [vmem:[%s755_s5] sm:$0xff]  ;;  %564 = vmatpush3.msk.msra.mxu0 %vm72_vm1, %v377_v11 }
  0x18   :  { %561 = vmatmul.mubr.msk.f32.vlgmr.msra.gmra.mxu1 %vm68_vm2, %v297_v12  ;;  %565 = vmatprep.mubr.msk.f32.mxu0 %vm601_vm0, %v600_v0  ;;  %v524_v21 = vld [vmem:[%s759_s9] ss:$0 sm:$0xff] }
  0x19   :  { %459 = vperm.xlu0 %572, %v455_v13   ;;  %v525_v31 = vld [vmem:[%s762_s12] ss:$0 sm:$0xff] }
  0x1a   :  { %566 = vmatmul.mubr.msk.f32.vlgmr.msra.gmra.mxu0 %vm68_vm2, %v376_v14  ;;  %v526_v35 = vld [vmem:[%s763_s13] ss:$0 sm:$0xff] }
  0x94   :  { %v460_v22 = vpop.permute.xlu0 %459 }
  0x95   :  { %v468_v27 = vmul.f32 %v524_v21, %v460_v22 }
  0xd0   :  { %v142_v15 = vpop.f32.mrf.mxu0 }
  0xd2   :  { %v543_v16 = vpop.f32.mrf.mxu0 }
  0xd3   :  { %v216_v17 = vpop.f32.mrf.mxu1 }
  0xd4   :  { %v217_v18 = vadd.f32 %v216_v17, %v142_v15 }
  0xd5   :  { %v550_v19 = vpop.f32.mrf.mxu1 }
  0xd6   :  { %v292_v20 = vpop.f32.mrf.mxu0 }
  0xd7   :  { %v296_v23 = vadd.f32 %v292_v20, %v217_v18 }
  0xd8   :  { %v557_v24 = vpop.f32.mrf.mxu0  ;;  %v371_v25 = vpop.f32.mrf.mxu1 }
  0xd9   :  { %v375_v26 = vadd.f32 %v371_v25, %v296_v23 }
  0xda   :  { %v562_v28 = vpop.f32.mrf.mxu1  ;;  %v450_v29 = vpop.f32.mrf.mxu0 }
  0xdb   :  { %v454_v30 = vadd.f32 %v450_v29, %v375_v26 }
  0xdc   :  { %v567_v32 = vpop.f32.mrf.mxu0 }
  0xdd   :  { %v469_v33 = vadd.f32 %v468_v27, %v454_v30 }
  0xdf   :  { %v477_v34 = vadd.f32 %v525_v31, %v469_v33 }
  0xe1   :  { %v478_v36 = vmax.f32 %v477_v34, 0.0 }
  0xe3   :  { %v486_v37 = vmul.f32 %v526_v35, %v478_v36 }
  0xe5   :  { %v488_v38 = vsel %vm487_vm4, %v486_v37, 0.0 }
  0xe6   :  { %489 = vadd.xlane.f32.xlu0 %v488_v38 }
 0x16f   :  { %v490_v40 = vpop.xlane.xlu0 %489 }
 0x170   :  { %v493_v41 = vadd.f32 %v492_v39, %v490_v40 }
 0x172   :  { %v495_v42 = vand.u32 2147483647, %v493_v41  ;;  %v494_v53 = vmax.f32 %v493_v41, 0.0 }
 0x174   :  { %v496_v43 = vsub.f32 0.0, %v495_v42 }
 0x176   :  { %v497_v44 = vmul.f32 1.442695, %v496_v43 }
 0x178   :  { %573 = vpow2.f32 %v497_v44 }
 0x185   :  { %v574_v45 = vpop.eup %573 }
 0x186   :  { %v499_v46 = vadd.f32 1.0, %v574_v45  ;;  %v502_v47 = vmul.f32 -0.5, %v574_v45  ;;  %v505_v49 = vand.u32 2147483647, %v574_v45 }
 0x188   :  { %575 = vlog2.f32 %v499_v46  ;;  %v503_v48 = vadd.f32 1.0, %v502_v47  ;;  %vm506_vm5 = vcmp.lt.f32.partialorder %v505_v49, 0.0004427343 }
 0x18a   :  { %v504_v52 = vmul.f32 %v574_v45, %v503_v48 }
 0x195   :  { %v576_v50 = vpop.eup %575 }
 0x196   :  { %v501_v51 = vmul.f32 0.6931472, %v576_v50 }
 0x198   :  { %v507_v54 = vsel %vm506_vm5, %v504_v52, %v501_v51 }
 0x199   :  { %v508_v55 = vadd.f32 %v507_v54, %v494_v53 }
 0x19b   :  { %510 = vst.msk [vmem:[%s765_s15] sm:$0xff] %vm509_vm6, %v508_v55 }
 0x19c   :  { %515 = vsyncpa [#allocation4], 1 }

</bundles_post_ra>
